<compile_context>
chip_gen: v7x
topology: tpu7x:2x2x1
jax: 0.10.0
libtpu: 0.0.40
codegen_flags: <defaults>
</compile_context>

<pallas_src>
import math

import jax
import jax.numpy as jnp
from jax.experimental import pallas as pl
from jax.experimental.pallas import tpu as pltpu


def _identity_kernel(x_ref, o_ref):
    # Pure streaming pass-through: load the tile, store the tile.
    o_ref[...] = x_ref[...]


def _cdiv(a, b):
    return -(-a // b)


def _tpu_generation():
    """Best-effort TPU generation detection (5 / 6 / 7), None if unknown."""
    try:
        kind = jax.devices()[0].device_kind.lower()
    except Exception:  # pragma: no cover - no accelerator visible
        return None
    for gen in (7, 6, 5):
        if f"v{gen}" in kind:
            return gen
    return None


def _tile_and_vmem_targets():
    """(per-buffer tile target bytes, explicit vmem_limit_bytes or None)."""
    gen = _tpu_generation()
    if gen == 7:
        # 64 MiB physical VMEM / TC, 3.2 TB/s HBM: 8 MiB tiles, and raise the
        # scoped limit (2 arrays x 2 buffers x 8 MiB = 32 MiB) with headroom.
        return 8 << 20, 48 << 20
    if gen == 6:
        # 16 MiB total of double buffers, under the 32 MiB default limit.
        return 4 << 20, None
    # v5e / unknown: stay well under the 16 MiB default scoped-VMEM limit.
    return 2 << 20, None


def _choose_2d_view(total):
    """Lane-dense (rows, cols, pad) factorization of the flattened tensor.

    cols is ALWAYS a multiple of 128, so blocks are stored unpadded in VMEM
    and stores are unmasked vst.  When `total` is not a multiple of 128, the
    flat array is zero-padded up to a multiple of 1024 (8x128).
    """
    if total % 128 == 0:
        padded = total
    else:
        padded = _cdiv(total, 1024) * 1024
    pad = padded - total

    cols = 128
    # Widen the lane axis (longer DMA descriptors) while keeping enough rows
    # (>= 32) to allow multiple-of-32 row tiles and a multi-step grid.
    while (padded % (cols * 2) == 0
           and cols * 2 <= 8192
           and padded // (cols * 2) >= 32):
        cols *= 2
    rows = padded // cols
    return rows, cols, pad


def _choose_row_tile(rows, cols, itemsize, target_bytes):
    """Row-tile size: ~target bytes/buffer, multiple of 32, >=4 even steps."""
    bytes_per_row = cols * itemsize  # cols is a multiple of 128 -> no lane pad
    total_bytes = rows * bytes_per_row

    # Small tensors: one full-extent block (always a legal BlockSpec).
    if rows <= 32 or total_bytes <= target_bytes:
        return rows

    # At least 4 pipeline steps so input/output DMAs overlap, and an even
    # step count so both v7x TensorCores get equal work.
    steps = max(4, _cdiv(total_bytes, target_bytes))
    if steps % 2:
        steps += 1

    tile = _cdiv(rows, steps)
    # Multiple of 32 sublanes covers f32 (8), bf16 (16), int8/fp8 (32) packing.
    tile = max(32, _cdiv(tile, 32) * 32)
    return min(tile, rows)


def pallas_identity_copy(x):
    """Materialized identity copy of x as a tiled, pipelined Pallas kernel."""
    orig_shape = x.shape
    dtype = x.dtype
    itemsize = jnp.dtype(dtype).itemsize
    total = math.prod(orig_shape) if orig_shape else 1
    if total == 0:
        return x

    target_bytes, vmem_limit = _tile_and_vmem_targets()

    rows, cols, pad = _choose_2d_view(total)
    xf = x.reshape(total)
    if pad:
        xf = jnp.pad(xf, (0, pad))
    x2d = xf.reshape(rows, cols)

    tile_r = _choose_row_tile(rows, cols, itemsize, target_bytes)
    grid = (_cdiv(rows, tile_r),)

    compiler_params = pltpu.CompilerParams(
        # TODO(synk): verify in an xprof trace that "parallel" shards the row
        # grid across both v7x TensorCores; switch to pltpu.CORE_PARALLEL if
        # one core sits idle.
        dimension_semantics=("parallel",),
        vmem_limit_bytes=vmem_limit,
    )

    out2d = pl.pallas_call(
        _identity_kernel,
        out_shape=jax.ShapeDtypeStruct((rows, cols), dtype),
        grid_spec=pl.GridSpec(
            grid=grid,
            in_specs=[pl.BlockSpec((tile_r, cols), lambda i: (i, 0))],
            out_specs=pl.BlockSpec((tile_r, cols), lambda i: (i, 0)),
        ),
        compiler_params=compiler_params,
        cost_estimate=pl.CostEstimate(
            flops=0,
            transcendentals=0,
            bytes_accessed=2 * total * itemsize,
        ),
    )(x2d)

    out_flat = out2d.reshape(rows * cols)
    if pad:
        out_flat = out_flat[:total]
    return out_flat.reshape(orig_shape)


def shortcut_block_forward(x, submodule=None, materialize=False):
    """Pallas equivalent of ShortcutBlock.forward.

    Default (materialize=False) is the faithful, zero-overhead translation:
    no kernel launch, the input array is returned as-is -- exactly like the
    PyTorch module, which does no array compute.

    With materialize=True an explicit identity-copy kernel is run (tiled,
    double-buffered streaming copy), for callers that require a fresh buffer.
    """
    if materialize:
        x = pallas_identity_copy(x)
    # TODO(synk): the second element of the PyTorch return is the nn.Module
    # object itself (self.sub); there is no tensor/kernel equivalent, so the
    # Python handle is simply passed through.
    return x, submodule


if __name__ == "__main__":
    key = jax.random.PRNGKey(0)
    x = jax.random.normal(key, (2, 4, 16, 16), dtype=jnp.float32)

    # Stand-in "submodule" handle (forward() uses no parameters from it).
    submodule = {"name": "identity_sub"}

    # Fast path: the faithful translation -- no kernel launch at all.
    y_fast, sub_fast = shortcut_block_forward(x, submodule)
    assert y_fast is x
    assert sub_fast is submodule

    # Materializing path: run the Pallas identity-copy kernel once.
    y, sub = shortcut_block_forward(x, submodule, materialize=True)
    y = jax.block_until_ready(y)
    assert y.shape == x.shape and y.dtype == x.dtype
    assert bool(jnp.all(y == x))
    assert sub is submodule

    # Exercise the lane-padding path (total not a multiple of 128).
    k1, k2 = jax.random.split(key)
    x_odd = jax.random.normal(k1, (3, 5, 7), dtype=jnp.float32)
    y_odd, _ = shortcut_block_forward(x_odd, submodule, materialize=True)
    y_odd = jax.block_until_ready(y_odd)
    assert y_odd.shape == x_odd.shape
    assert bool(jnp.all(y_odd == x_odd))

    # Exercise the multi-step (>= 4 even grid steps) tiled path (~4 MiB).
    x_big = jax.random.normal(k2, (1024, 1024), dtype=jnp.float32)
    y_big, _ = shortcut_block_forward(x_big, submodule, materialize=True)
    y_big = jax.block_until_ready(y_big)
    assert bool(jnp.all(y_big == x_big))

    print("KERNEL_OK")
</pallas_src>

<mosaic_0001>
module attributes {stable_mosaic.version = 11 : i64} {
  func.func @_identity_kernel(%arg0: i32, %arg1: memref<16x128xf32, #tpu.memory_space<vmem>>, %arg2: memref<16x128xf32, #tpu.memory_space<vmem>>) attributes {dimension_semantics = [#tpu.dimension_semantics<parallel>], iteration_bounds = array<i64: 1>, scalar_prefetch = 0 : i64, scratch_operands = 0 : i64, tpu.core_type = #tpu.core_type<tc>, window_params = [{transform_indices = @transform_0, window_bounds = array<i64: 16, 128>}, {transform_indices = @transform_1, window_bounds = array<i64: 16, 128>}]} {
    %c0 = arith.constant 0 : index
    %c0_0 = arith.constant 0 : index
    %0 = vector.load %arg1[%c0, %c0_0] : memref<16x128xf32, #tpu.memory_space<vmem>>, vector<16x128xf32>
    %c0_1 = arith.constant 0 : index
    %c0_2 = arith.constant 0 : index
    %1 = vector.load %arg2[%c0_1, %c0_2] : memref<16x128xf32, #tpu.memory_space<vmem>>, vector<16x128xf32>
    tpu.vector_store %arg2[%c0_1, %c0_2], %0 {strides = array<i32>} : memref<16x128xf32, #tpu.memory_space<vmem>>, vector<16x128xf32>,
    return
  }
  func.func @transform_0(%arg0: i32) -> (i32, i32) {
    %c0_i32 = arith.constant 0 : i32
    %c0_i32_0 = arith.constant 0 : i32
    return %arg0, %c0_i32 : i32, i32
  }
  func.func @transform_1(%arg0: i32) -> (i32, i32) {
    %c0_i32 = arith.constant 0 : i32
    %c0_i32_0 = arith.constant 0 : i32
    return %arg0, %c0_i32 : i32, i32
  }
}

</mosaic_0001>

<bundles_post_ra>
// kernel: tpu_custom_call.1
= control target key start
LH: loop header
LB: loop body
LE: loop exit
PB: predicated region body
PF: predicated region fallthrough
CT: control target
= control target key end

     0   :  { %6 = vsyncpa [#allocation3], 0  ;;  %s134_s0 = inlined_call_operand.hbm [shape: f32[16,128], index: 0, kind: input, shape index: {}]   ;;  %s135_s1 = inlined_call_operand.hbm [shape: f32[16,128], index: 1, kind: output, shape index: {}]  }
   0x1   :  { %7 = vsyncpa [#allocation4], 0  ;;  %s96_s6 = smov [#allocation2]   ;;  %s48_s10 = scalar_lea.hbm %s134_s0, 256 }
   0x2   :  { %s13_s7 = sshll.u32 %s96_s6, 4  ;;  %p49_p0 = scmp.ne.s32.totalorder %s134_s0, %s48_s10  ;;  %s14_s7 = int_to_ptr.vmem [resolvable:$true] %s13_s7 }
   0x3   :  { %p52_p1 = scmp.lt.u32.totalorder %s48_s10, %s134_s0 }
   0x5   :  { %p54_p2 = pnand %p52_p1, %p49_p0 }
   0x7   :  { %57 = shalt.err (!%p54_p2)
}
   0x8   :  { %s58_s15 = scalar_lea.vmem %s14_s7, 256  ;;  %p63_p4 = scmp.lt.s32.totalorder %s14_s7, %s14_s7 }
   0x9   :  { %p59_p3 = scmp.ne.s32.totalorder %s14_s7, %s58_s15  ;;  %p64_p5 = scmp.lt.s32.totalorder %s58_s15, %s58_s15 }
   0xb   :  { %p65_p6 = por %p64_p5, %p63_p4 }
   0xd   :  { %p66_p7 = pnand %p65_p6, %p59_p3 }
   0xf   :  { %69 = shalt.err (!%p66_p7)
}
  0x10   :  { %s97_s16 = smov 128   ;;  %s98_s17 = smov 8  }
  0x11   :  { %19 = dma.hbm_to_vmem [thread:$0]  %s134_s0, 256, %s14_s7, [#allocation3], %s97_s16, %s97_s16, %s98_s17  }
  0x12   :  { %92 = dma.done.wait [#allocation3], 256  }
  0x13   :  { %93 = vsyncadd [#allocation3], 4294967040  ;;  %s99_s20 = smov [#allocation5]   ;;  %v23_v0 = vld [vmem:[#allocation2] sm:$0xff]  ;;  %v24_v1 = vld [vmem:[#allocation2 + $0x8] sm:$0xff] }
  0x14   :  { %s32_s21 = sshll.u32 %s99_s20, 4  ;;  %25 = vst [vmem:[#allocation5] sm:$0xff] %v23_v0  ;;  %26 = vst [vmem:[#allocation5 + $0x8] sm:$0xff] %v24_v1  ;;  %s33_s21 = int_to_ptr.vmem [resolvable:$true] %s32_s21 }
  0x15   :  { %s70_s22 = scalar_lea.vmem %s33_s21, 256  ;;  %p75_p9 = scmp.lt.s32.totalorder %s33_s21, %s33_s21 }
  0x16   :  { %p71_p8 = scmp.ne.s32.totalorder %s33_s21, %s70_s22  ;;  %p76_p10 = scmp.lt.s32.totalorder %s70_s22, %s70_s22 }
  0x18   :  { %p77_p11 = por %p76_p10, %p75_p9 }
  0x1a   :  { %p78_p12 = pnand %p77_p11, %p71_p8 }
  0x1c   :  { %81 = shalt.err (!%p78_p12)
}
  0x1d   :  { %s82_s0 = scalar_lea.hbm %s135_s1, 256 }
  0x1e   :  { %p83_p13 = scmp.ne.s32.totalorder %s135_s1, %s82_s0  ;;  %p86_p0 = scmp.lt.u32.totalorder %s82_s0, %s135_s1 }
  0x20   :  { %p88_p1 = pnand %p86_p0, %p83_p13 }
  0x22   :  { %91 = shalt.err (!%p88_p1)
}
  0x23   :  { %38 = dma.vmem_to_hbm [thread:$0]  %s33_s21, 256, %s135_s1, [#allocation4], %s97_s16, %s97_s16, %s98_s17  }
  0x24   :  { %94 = dma.done.wait [#allocation4], 256  }
  0x25   :  { %95 = vsyncadd [#allocation4], 4294967040 }
  0x26   :  { %42 = vsyncpa [#allocation3], 1 }
  0x27   :  { %43 = vsyncpa [#allocation4], 1 }

</bundles_post_ra>
